<compile_context>
chip_gen: v7x
topology: tpu7x:2x2x1
jax: 0.10.0
libtpu: 0.0.40
codegen_flags: <defaults>
</compile_context>

<pallas_src>
import functools

import jax
import jax.numpy as jnp
from jax.experimental import pallas as pl
from jax.experimental.pallas import tpu as pltpu

BOARD = 8
IN_DIM = BOARD * BOARD        # 64
H1 = 128
H2 = 128
OUT_DIM = BOARD * BOARD       # 64
PAD = 128                     # lane-padded feature width for input / output
DEFAULT_TILE_B = 1024         # multiple of 256; ~2-3 MiB working set per step


def _mlp_kernel(x_ref, w1_ref, b1_ref, w2_ref, b2_ref, w3_ref, b3_ref, o_ref):
    # x_ref: (TILE_B, 128) bf16, weights bf16, biases f32, o_ref (TILE_B, 128) f32
    x = x_ref[...]

    # lin1 + ReLU  (MXU in bf16, f32 accumulate; elementwise in f32)
    h1 = jnp.dot(x, w1_ref[...], preferred_element_type=jnp.float32) + b1_ref[...]
    h1 = jnp.maximum(h1, 0.0).astype(w2_ref.dtype)

    # lin2 + ReLU
    h2 = jnp.dot(h1, w2_ref[...], preferred_element_type=jnp.float32) + b2_ref[...]
    h2 = jnp.maximum(h2, 0.0).astype(w3_ref.dtype)

    # lin3 (output layer). Padded output lanes carry bias = -1e30 -> exp == 0,
    # so softmax over all 128 lanes normalizes exactly over the real 64 lanes.
    logits = jnp.dot(h2, w3_ref[...], preferred_element_type=jnp.float32) + b3_ref[...]

    # numerically stable softmax over last dim
    m = jnp.max(logits, axis=-1, keepdims=True)
    e = jnp.exp(logits - m)
    denom = jnp.sum(e, axis=-1, keepdims=True)
    o_ref[...] = (e * pl.reciprocal(denom, approx=True)).astype(o_ref.dtype)


@functools.partial(jax.jit, static_argnames=("tile_b", "compute_dtype"))
def _mlp_forward_2d(x, params, tile_b, compute_dtype):
    """x: (B, 64) float32. Returns softmax probabilities (B, 64) float32."""
    w1, b1, w2, b2, w3, b3 = params
    B = x.shape[0]

    # ---- pick a batch tile (multiple of 8 sublanes, capped by padded batch) ----
    tile_b = max(8, (int(tile_b) // 8) * 8)
    b_pad8 = ((B + 7) // 8) * 8
    tb = min(tile_b, b_pad8)
    n_steps = pl.cdiv(B, tb)
    b_pad = n_steps * tb

    # ---- pad / cast operands (zero-padded lanes & rows contribute nothing) ----
    x_p = jnp.pad(x, ((0, b_pad - B), (0, PAD - IN_DIM))).astype(compute_dtype)
    w1_p = jnp.pad(w1, ((0, PAD - IN_DIM), (0, 0))).astype(compute_dtype)   # (128,128)
    w2_p = w2.astype(compute_dtype)                                          # (128,128)
    w3_p = jnp.pad(w3, ((0, 0), (0, PAD - OUT_DIM))).astype(compute_dtype)   # (128,128)
    b1_p = b1.astype(jnp.float32)                                            # (1,128)
    b2_p = b2.astype(jnp.float32)                                            # (1,128)
    b3_p = jnp.full((1, PAD), -1e30, jnp.float32).at[:, :OUT_DIM].set(
        b3.reshape(1, OUT_DIM).astype(jnp.float32))                          # (1,128)

    resident = lambda i: (0, 0)   # weights / biases stay in VMEM across steps
    out = pl.pallas_call(
        _mlp_kernel,
        out_shape=jax.ShapeDtypeStruct((b_pad, PAD), jnp.float32),
        grid=(n_steps,),
        in_specs=[
            pl.BlockSpec((tb, PAD), lambda i: (i, 0)),   # x tile (pipelined)
            pl.BlockSpec((PAD, H1), resident),           # w1
            pl.BlockSpec((1, H1), resident),             # b1
            pl.BlockSpec((H1, H2), resident),            # w2
            pl.BlockSpec((1, H2), resident),             # b2
            pl.BlockSpec((H2, PAD), resident),           # w3
            pl.BlockSpec((1, PAD), resident),            # b3
        ],
        out_specs=pl.BlockSpec((tb, PAD), lambda i: (i, 0)),
        compiler_params=pltpu.CompilerParams(
            dimension_semantics=("parallel",)),
    )(x_p, w1_p, b1_p, w2_p, b2_p, w3_p, b3_p)

    return out[:B, :OUT_DIM]


def mlp_forward(seq, params, *, tile_b=DEFAULT_TILE_B, compute_dtype=jnp.bfloat16):
    """Mirrors MLP.forward: np.squeeze + torch.flatten + lin/act stack + softmax.

    seq: (B, board, board) float32 (or (board, board) / (1, board, board) for a
    single board, which — like the PyTorch code — returns a 1-D distribution).
    """
    seq = jnp.asarray(seq, jnp.float32)
    seq_sq = jnp.squeeze(seq)               # same (fragile) semantics as np.squeeze
    single = seq_sq.ndim <= 2
    if single:
        x = seq_sq.reshape(1, -1)           # flatten(start_dim=0) -> batch of 1
    else:
        x = seq_sq.reshape(seq_sq.shape[0], -1)   # flatten(start_dim=1) -> (B, 64)

    out = _mlp_forward_2d(x, params, tile_b, compute_dtype)
    return out[0] if single else out


def init_params(key):
    """Deterministic PyTorch-style (uniform +-1/sqrt(fan_in)) initialization."""
    ks = jax.random.split(key, 6)

    def lin(kw, kb, fan_in, fan_out):
        bound = 1.0 / jnp.sqrt(fan_in)
        w = jax.random.uniform(kw, (fan_in, fan_out), jnp.float32, -bound, bound)
        b = jax.random.uniform(kb, (1, fan_out), jnp.float32, -bound, bound)
        return w, b

    w1, b1 = lin(ks[0], ks[1], IN_DIM, H1)
    w2, b2 = lin(ks[2], ks[3], H1, H2)
    w3, b3 = lin(ks[4], ks[5], H2, OUT_DIM)
    return (w1, b1, w2, b2, w3, b3)


def _reference(seq, params, compute_dtype=jnp.bfloat16):
    """Pure-JAX reference with the same bf16 rounding of MXU operands."""
    w1, b1, w2, b2, w3, b3 = params
    x = jnp.squeeze(seq).reshape(seq.shape[0], -1)
    r = lambda a: a.astype(compute_dtype).astype(jnp.float32)
    h1 = jnp.maximum(r(x) @ r(w1) + b1, 0.0)
    h2 = jnp.maximum(r(h1) @ r(w2) + b2, 0.0)
    logits = r(h2) @ r(w3) + b3
    return jax.nn.softmax(logits, axis=-1)


if __name__ == "__main__":
    key = jax.random.PRNGKey(0)
    k_params, k_x1, k_x2 = jax.random.split(key, 3)
    params = init_params(k_params)

    # --- small example: batch=2 Othello boards (2, 8, 8) ---
    seq = jax.random.normal(k_x1, (2, BOARD, BOARD), dtype=jnp.float32)
    out = jax.block_until_ready(mlp_forward(seq, params))
    ref = _reference(seq, params)
    assert out.shape == (2, OUT_DIM)
    assert jnp.allclose(out, ref, atol=3e-3, rtol=1e-2)
    assert jnp.allclose(jnp.sum(out, axis=-1), 1.0, atol=3e-3)

    # --- larger batch with a non-dividing size to exercise the multi-step grid ---
    seq_big = jax.random.normal(k_x2, (300, BOARD, BOARD), dtype=jnp.float32)
    out_big = jax.block_until_ready(mlp_forward(seq_big, params, tile_b=128))
    ref_big = _reference(seq_big, params)
    assert out_big.shape == (300, OUT_DIM)
    assert jnp.allclose(out_big, ref_big, atol=3e-3, rtol=1e-2)
    assert jnp.allclose(jnp.sum(out_big, axis=-1), 1.0, atol=3e-3)

    print("KERNEL_OK")
</pallas_src>

<mosaic_0001>
module attributes {stable_mosaic.version = 11 : i64} {
  func.func @_mlp_kernel(%arg0: i32, %arg1: memref<8x128xbf16, #tpu.memory_space<vmem>>, %arg2: memref<128x128xbf16, #tpu.memory_space<vmem>>, %arg3: memref<1x128xf32, #tpu.memory_space<vmem>>, %arg4: memref<128x128xbf16, #tpu.memory_space<vmem>>, %arg5: memref<1x128xf32, #tpu.memory_space<vmem>>, %arg6: memref<128x128xbf16, #tpu.memory_space<vmem>>, %arg7: memref<1x128xf32, #tpu.memory_space<vmem>>, %arg8: memref<8x128xf32, #tpu.memory_space<vmem>>) attributes {dimension_semantics = [#tpu.dimension_semantics<parallel>], iteration_bounds = array<i64: 1>, scalar_prefetch = 0 : i64, scratch_operands = 0 : i64, tpu.core_type = #tpu.core_type<tc>, window_params = [{transform_indices = @transform_0, window_bounds = array<i64: 8, 128>}, {pipeline_mode = #tpu.pipeline_mode<synchronous>, transform_indices = @transform_1, window_bounds = array<i64: 128, 128>}, {pipeline_mode = #tpu.pipeline_mode<synchronous>, transform_indices = @transform_2, window_bounds = array<i64: 1, 128>}, {pipeline_mode = #tpu.pipeline_mode<synchronous>, transform_indices = @transform_3, window_bounds = array<i64: 128, 128>}, {pipeline_mode = #tpu.pipeline_mode<synchronous>, transform_indices = @transform_4, window_bounds = array<i64: 1, 128>}, {pipeline_mode = #tpu.pipeline_mode<synchronous>, transform_indices = @transform_5, window_bounds = array<i64: 128, 128>}, {pipeline_mode = #tpu.pipeline_mode<synchronous>, transform_indices = @transform_6, window_bounds = array<i64: 1, 128>}, {transform_indices = @transform_7, window_bounds = array<i64: 8, 128>}]} {
    %c0 = arith.constant 0 : index
    %c0_0 = arith.constant 0 : index
    %0 = vector.load %arg1[%c0, %c0_0] : memref<8x128xbf16, #tpu.memory_space<vmem>>, vector<8x128xbf16>
    %c0_1 = arith.constant 0 : index
    %c0_2 = arith.constant 0 : index
    %1 = vector.load %arg2[%c0_1, %c0_2] : memref<128x128xbf16, #tpu.memory_space<vmem>>, vector<128x128xbf16>
    %cst = arith.constant dense<0.000000e+00> : vector<8x128xf32>
    %2 = tpu.matmul %0, %1, %cst {dimension_numbers = #tpu.dot_dimension_numbers<[1], [0], [0], [1], [0, 0, 1, 1], [], []>} : vector<8x128xbf16>, vector<128x128xbf16>, vector<8x128xf32> -> vector<8x128xf32>
    %c0_3 = arith.constant 0 : index
    %c0_4 = arith.constant 0 : index
    %3 = vector.load %arg3[%c0_3, %c0_4] : memref<1x128xf32, #tpu.memory_space<vmem>>, vector<1x128xf32>
    %4 = vector.broadcast %3 : vector<1x128xf32> to vector<8x128xf32>
    %5 = arith.addf %2, %4 : vector<8x128xf32>
    %cst_5 = arith.constant 0.000000e+00 : f32
    %6 = vector.broadcast %cst_5 : f32 to vector<8x128xf32>
    %7 = arith.maximumf %5, %6 : vector<8x128xf32>
    %8 = arith.truncf %7 : vector<8x128xf32> to vector<8x128xbf16>
    %c0_6 = arith.constant 0 : index
    %c0_7 = arith.constant 0 : index
    %9 = vector.load %arg4[%c0_6, %c0_7] : memref<128x128xbf16, #tpu.memory_space<vmem>>, vector<128x128xbf16>
    %cst_8 = arith.constant dense<0.000000e+00> : vector<8x128xf32>
    %10 = tpu.matmul %8, %9, %cst_8 {dimension_numbers = #tpu.dot_dimension_numbers<[1], [0], [0], [1], [0, 0, 1, 1], [], []>} : vector<8x128xbf16>, vector<128x128xbf16>, vector<8x128xf32> -> vector<8x128xf32>
    %c0_9 = arith.constant 0 : index
    %c0_10 = arith.constant 0 : index
    %11 = vector.load %arg5[%c0_9, %c0_10] : memref<1x128xf32, #tpu.memory_space<vmem>>, vector<1x128xf32>
    %12 = vector.broadcast %11 : vector<1x128xf32> to vector<8x128xf32>
    %13 = arith.addf %10, %12 : vector<8x128xf32>
    %cst_11 = arith.constant 0.000000e+00 : f32
    %14 = vector.broadcast %cst_11 : f32 to vector<8x128xf32>
    %15 = arith.maximumf %13, %14 : vector<8x128xf32>
    %16 = arith.truncf %15 : vector<8x128xf32> to vector<8x128xbf16>
    %c0_12 = arith.constant 0 : index
    %c0_13 = arith.constant 0 : index
    %17 = vector.load %arg6[%c0_12, %c0_13] : memref<128x128xbf16, #tpu.memory_space<vmem>>, vector<128x128xbf16>
    %cst_14 = arith.constant dense<0.000000e+00> : vector<8x128xf32>
    %18 = tpu.matmul %16, %17, %cst_14 {dimension_numbers = #tpu.dot_dimension_numbers<[1], [0], [0], [1], [0, 0, 1, 1], [], []>} : vector<8x128xbf16>, vector<128x128xbf16>, vector<8x128xf32> -> vector<8x128xf32>
    %c0_15 = arith.constant 0 : index
    %c0_16 = arith.constant 0 : index
    %19 = vector.load %arg7[%c0_15, %c0_16] : memref<1x128xf32, #tpu.memory_space<vmem>>, vector<1x128xf32>
    %20 = vector.broadcast %19 : vector<1x128xf32> to vector<8x128xf32>
    %21 = arith.addf %18, %20 : vector<8x128xf32>
    %cst_17 = arith.constant dense<0xFF800000> : vector<8xf32>
    %22 = vector.multi_reduction <maximumf>, %21, %cst_17 [1] : vector<8x128xf32> to vector<8xf32>
    %23 = vector.shape_cast %22 : vector<8xf32> to vector<8x1xf32>
    %24 = vector.broadcast %23 : vector<8x1xf32> to vector<8x128xf32>
    %25 = arith.subf %21, %24 : vector<8x128xf32>
    %26 = math.exp %25 : vector<8x128xf32>
    %cst_18 = arith.constant dense<0.000000e+00> : vector<8xf32>
    %27 = vector.multi_reduction <add>, %26, %cst_18 [1] : vector<8x128xf32> to vector<8xf32>
    %28 = vector.shape_cast %27 : vector<8xf32> to vector<8x1xf32>
    %29 = tpu.reciprocal %28 {approx = true} : vector<8x1xf32> -> vector<8x1xf32>
    %30 = vector.broadcast %29 : vector<8x1xf32> to vector<8x128xf32>
    %31 = arith.mulf %26, %30 : vector<8x128xf32>
    %c0_19 = arith.constant 0 : index
    %c0_20 = arith.constant 0 : index
    %32 = vector.load %arg8[%c0_19, %c0_20] : memref<8x128xf32, #tpu.memory_space<vmem>>, vector<8x128xf32>
    tpu.vector_store %arg8[%c0_19, %c0_20], %31 {strides = array<i32>} : memref<8x128xf32, #tpu.memory_space<vmem>>, vector<8x128xf32>,
    return
  }
  func.func @transform_0(%arg0: i32) -> (i32, i32) {
    %c0_i32 = arith.constant 0 : i32
    %c0_i32_0 = arith.constant 0 : i32
    return %arg0, %c0_i32 : i32, i32
  }
  func.func @transform_1(%arg0: i32) -> (i32, i32) {
    %c0_i32 = arith.constant 0 : i32
    %c0_i32_0 = arith.constant 0 : i32
    %c0_i32_1 = arith.constant 0 : i32
    return %c0_i32, %c0_i32_0 : i32, i32
  }
  func.func @transform_2(%arg0: i32) -> (i32, i32) {
    %c0_i32 = arith.constant 0 : i32
    %c0_i32_0 = arith.constant 0 : i32
    %c0_i32_1 = arith.constant 0 : i32
    return %c0_i32, %c0_i32_0 : i32, i32
  }
  func.func @transform_3(%arg0: i32) -> (i32, i32) {
    %c0_i32 = arith.constant 0 : i32
    %c0_i32_0 = arith.constant 0 : i32
    %c0_i32_1 = arith.constant 0 : i32
    return %c0_i32, %c0_i32_0 : i32, i32
  }
  func.func @transform_4(%arg0: i32) -> (i32, i32) {
    %c0_i32 = arith.constant 0 : i32
    %c0_i32_0 = arith.constant 0 : i32
    %c0_i32_1 = arith.constant 0 : i32
    return %c0_i32, %c0_i32_0 : i32, i32
  }
  func.func @transform_5(%arg0: i32) -> (i32, i32) {
    %c0_i32 = arith.constant 0 : i32
    %c0_i32_0 = arith.constant 0 : i32
    %c0_i32_1 = arith.constant 0 : i32
    return %c0_i32, %c0_i32_0 : i32, i32
  }
  func.func @transform_6(%arg0: i32) -> (i32, i32) {
    %c0_i32 = arith.constant 0 : i32
    %c0_i32_0 = arith.constant 0 : i32
    %c0_i32_1 = arith.constant 0 : i32
    return %c0_i32, %c0_i32_0 : i32, i32
  }
  func.func @transform_7(%arg0: i32) -> (i32, i32) {
    %c0_i32 = arith.constant 0 : i32
    %c0_i32_0 = arith.constant 0 : i32
    return %arg0, %c0_i32 : i32, i32
  }
}

</mosaic_0001>

<bundles_post_ra>
// kernel: _mlp_forward_2d.1
= control target key start
LH: loop header
LB: loop body
LE: loop exit
PB: predicated region body
PF: predicated region fallthrough
CT: control target
= control target key end

     0   :  { %v523_v0 = vmov 0.0   ;;  %vm524_vm0 = vmmov 0   ;;  %s682_s1 = inlined_call_operand.vmem [shape: bf16[128,128], index: 1, kind: input, shape index: {}]   ;;  %s683_s3 = inlined_call_operand.vmem [shape: bf16[128,128], index: 3, kind: input, shape index: {}]   ;;  %s684_s0 = inlined_call_operand.vmem [shape: bf16[8,128], index: 0, kind: input, shape index: {}]   ;;  %s685_s5 = inlined_call_operand.vmem [shape: bf16[128,128], index: 5, kind: input, shape index: {}]   ;;  %s686_s2 = inlined_call_operand.vmem [shape: f32[1,128], index: 2, kind: input, shape index: {}]   ;;  %s687_s4 = inlined_call_operand.vmem [shape: f32[1,128], index: 4, kind: input, shape index: {}]   ;;  %s688_s6 = inlined_call_operand.vmem [shape: f32[1,128], index: 6, kind: input, shape index: {}]   ;;  %s689_s7 = inlined_call_operand.vmem [shape: f32[8,128], index: 7, kind: output, shape index: {}]  }
   0x1   :  { %433 = vmatprep.subr.bf16.mxu0 %v523_v0  ;;  %v495_v1 = vld [vmem:[%s682_s1] sm:$0xff]   ;;  %449 = vmatprep.mubr.msk.bf16.mxu0 %vm524_vm0, %v523_v0  ;;  %v496_v2 = vld [vmem:[%s682_s1 + $0x8] sm:$0xff]   ;;  %v497_v3 = vld [vmem:[%s682_s1 + $0x10] sm:$0xff]  }
   0x2   :  { %453 = vmatprep.subr.bf16.mxu1 %v523_v0  ;;  %469 = vmatprep.mubr.msk.bf16.mxu1 %vm524_vm0, %v523_v0  ;;  %v503_v4 = vld [vmem:[%s683_s3] sm:$0xff]   ;;  %v498_v5 = vld [vmem:[%s682_s1 + $0x18] sm:$0xff]   ;;  %v504_v6 = vld [vmem:[%s683_s3 + $0x8] sm:$0xff]  }
   0x3   :  { %434 = vmatpush3.bf16.msra.mxu0 %v495_v1  ;;  %454 = vmatpush3.bf16.msra.mxu1 %v503_v4  ;;  %v499_v7 = vld [vmem:[%s682_s1 + $0x20] sm:$0xff]   ;;  %v505_v8 = vld [vmem:[%s683_s3 + $0x10] sm:$0xff]   ;;  %v500_v9 = vld [vmem:[%s682_s1 + $0x28] sm:$0xff]  }
   0x4   :  { %435 = vmatprep.subr.bf16.mxu0 %v523_v0  ;;  %455 = vmatprep.subr.bf16.mxu1 %v523_v0  ;;  %v506_v10 = vld [vmem:[%s683_s3 + $0x18] sm:$0xff]   ;;  %v501_v11 = vld [vmem:[%s682_s1 + $0x30] sm:$0xff]   ;;  %v507_v12 = vld [vmem:[%s683_s3 + $0x20] sm:$0xff]  }
   0x5   :  { %v502_v13 = vld [vmem:[%s682_s1 + $0x38] sm:$0xff]   ;;  %v508_v14 = vld [vmem:[%s683_s3 + $0x28] sm:$0xff]   ;;  %v27_v15 = vld [vmem:[%s684_s0] sm:$0xf] }
   0x6   :  { %v509_v16 = vld [vmem:[%s683_s3 + $0x30] sm:$0xff]   ;;  %v510_v17 = vld [vmem:[%s683_s3 + $0x38] sm:$0xff]   ;;  %v511_v18 = vld [vmem:[%s685_s5] sm:$0xff]  }
   0x7   :  { %436 = vmatpush3.bf16.msra.mxu0 %v496_v2  ;;  %456 = vmatpush3.bf16.msra.mxu1 %v504_v6  ;;  %v512_v19 = vld [vmem:[%s685_s5 + $0x8] sm:$0xff]   ;;  %v513_v20 = vld [vmem:[%s685_s5 + $0x10] sm:$0xff]   ;;  %v514_v21 = vld [vmem:[%s685_s5 + $0x18] sm:$0xff]  }
   0x8   :  { %437 = vmatprep.subr.bf16.mxu0 %v523_v0  ;;  %457 = vmatprep.subr.bf16.mxu1 %v523_v0  ;;  %v515_v22 = vld [vmem:[%s685_s5 + $0x20] sm:$0xff]   ;;  %v516_v23 = vld [vmem:[%s685_s5 + $0x28] sm:$0xff]   ;;  %v517_v32 = vld [vmem:[%s685_s5 + $0x30] sm:$0xff]  }
   0x9   :  { %v379_v24 = vld [vmem:[%s686_s2] ss:$0 sm:$0xff]  ;;  %v518_v33 = vld [vmem:[%s685_s5 + $0x38] sm:$0xff]  }
   0xa   :  { %v388_v34 = vld [vmem:[%s687_s4] ss:$0 sm:$0xff] }
   0xb   :  { %438 = vmatpush3.bf16.msra.mxu0 %v497_v3  ;;  %458 = vmatpush3.bf16.msra.mxu1 %v505_v8  ;;  %v397_v42 = vld [vmem:[%s688_s6] ss:$0 sm:$0xff] }
   0xc   :  { %439 = vmatprep.subr.bf16.mxu0 %v523_v0  ;;  %459 = vmatprep.subr.bf16.mxu1 %v523_v0 }
   0xf   :  { %440 = vmatpush3.bf16.msra.mxu0 %v498_v5  ;;  %460 = vmatpush3.bf16.msra.mxu1 %v506_v10 }
  0x10   :  { %441 = vmatprep.subr.bf16.mxu0 %v523_v0  ;;  %461 = vmatprep.subr.bf16.mxu1 %v523_v0 }
  0x13   :  { %442 = vmatpush3.bf16.msra.mxu0 %v499_v7  ;;  %462 = vmatpush3.bf16.msra.mxu1 %v507_v12 }
  0x14   :  { %443 = vmatprep.subr.bf16.mxu0 %v523_v0  ;;  %463 = vmatprep.subr.bf16.mxu1 %v523_v0 }
  0x17   :  { %444 = vmatpush3.bf16.msra.mxu0 %v500_v9  ;;  %464 = vmatpush3.bf16.msra.mxu1 %v508_v14 }
  0x18   :  { %445 = vmatprep.subr.bf16.mxu0 %v523_v0  ;;  %465 = vmatprep.subr.bf16.mxu1 %v523_v0 }
  0x1b   :  { %446 = vmatpush3.bf16.msra.mxu0 %v501_v11  ;;  %466 = vmatpush3.bf16.msra.mxu1 %v509_v16 }
  0x1c   :  { %447 = vmatprep.subr.bf16.mxu0 %v523_v0  ;;  %467 = vmatprep.subr.bf16.mxu1 %v523_v0 }
  0x1f   :  { %448 = vmatpush3.bf16.msra.mxu0 %v502_v13  ;;  %468 = vmatpush3.bf16.msra.mxu1 %v510_v17 }
  0x20   :  { %473 = vmatprep.subr.bf16.mxu0 %v523_v0 }
  0x22   :  { %450 = vmatmul.mubr.bf16.vlgmr.msra.gmra.mrb[0].mxu0 %v27_v15 }
  0x23   :  { %489 = vmatprep.mubr.msk.bf16.mxu0 %vm524_vm0, %v523_v0  ;;  %474 = vmatpush3.bf16.msra.mxu0 %v511_v18 }
  0x24   :  { %475 = vmatprep.subr.bf16.mxu0 %v523_v0 }
  0x27   :  { %476 = vmatpush3.bf16.msra.mxu0 %v512_v19 }
  0x28   :  { %477 = vmatprep.subr.bf16.mxu0 %v523_v0 }
  0x2b   :  { %478 = vmatpush3.bf16.msra.mxu0 %v513_v20 }
  0x2c   :  { %479 = vmatprep.subr.bf16.mxu0 %v523_v0 }
  0x2f   :  { %480 = vmatpush3.bf16.msra.mxu0 %v514_v21 }
  0x30   :  { %481 = vmatprep.subr.bf16.mxu0 %v523_v0 }
  0x33   :  { %482 = vmatpush3.bf16.msra.mxu0 %v515_v22 }
  0x34   :  { %483 = vmatprep.subr.bf16.mxu0 %v523_v0 }
  0x37   :  { %484 = vmatpush3.bf16.msra.mxu0 %v516_v23 }
  0x38   :  { %485 = vmatprep.subr.bf16.mxu0 %v523_v0 }
  0x3b   :  { %486 = vmatpush3.bf16.msra.mxu0 %v517_v32 }
  0x3c   :  { %487 = vmatprep.subr.bf16.mxu0 %v523_v0 }
  0x3f   :  { %488 = vmatpush3.bf16.msra.mxu0 %v518_v33 }
  0xf5   :  { %v133_v25 = vpop.f32.mrb[0].mxu0 }
  0xf6   :  { %v134_v26 = vadd.f32 %v379_v24, %v133_v25  ;;  %v451_v27 = vpop.f32.mrb[1].mxu0 }
  0xf7   :  { %v136_v28 = vpop.f32.mrb[2].mxu0 }
  0xf8   :  { %v139_v29 = vmax.f32 %v134_v26, 0.0  ;;  %v452_v30 = vpop.f32.mrb[3].mxu0 }
  0xfa   :  { %v140_v31 = vpack.c.bf16 %v139_v29, %v139_v29 }
  0xfc   :  { %470 = vmatmul.mubr.bf16.vlgmr.msra.gmra.mrb[0].mxu1 %v140_v31 }
 0x1cf   :  { %v246_v35 = vpop.f32.mrb[0].mxu1 }
 0x1d0   :  { %v247_v36 = vadd.f32 %v388_v34, %v246_v35  ;;  %v471_v37 = vpop.f32.mrb[1].mxu1 }
 0x1d1   :  { %v249_v38 = vpop.f32.mrb[2].mxu1 }
 0x1d2   :  { %v252_v39 = vmax.f32 %v247_v36, 0.0  ;;  %v472_v40 = vpop.f32.mrb[3].mxu1 }
 0x1d4   :  { %v253_v41 = vpack.c.bf16 %v252_v39, %v252_v39 }
 0x1d6   :  { %490 = vmatmul.mubr.bf16.vlgmr.msra.gmra.mrb[4].mxu0 %v253_v41 }
 0x2a9   :  { %v359_v43 = vpop.f32.mrb[4].mxu0 }
 0x2aa   :  { %v360_v44 = vadd.f32 %v397_v42, %v359_v43  ;;  %v491_v45 = vpop.f32.mrb[5].mxu0 }
 0x2ab   :  { %v362_v46 = vpop.f32.mrb[6].mxu0 }
 0x2ac   :  { %365 = vmax.xlane.f32.xlu0 %v360_v44  ;;  %v492_v47 = vpop.f32.mrb[7].mxu0 }
 0x339   :  { %v366_v48 = vpop.xlane.xlu0 %365 }
 0x33a   :  { %v367_v49 = vsub.f32 %v360_v44, %v366_v48 }
 0x33c   :  { %v368_v50 = vmul.f32 1.442695, %v367_v49 }
 0x33e   :  { %519 = vpow2.f32 %v368_v50 }
 0x348   :  { %v520_v51 = vpop.eup %519 }
 0x349   :  { %370 = vadd.xlane.f32.xlu0 %v520_v51 }
 0x3d6   :  { %v371_v52 = vpop.xlane.xlu0 %370 }
 0x3d7   :  { %521 = vrcp.f32 %v371_v52 }
 0x3e1   :  { %v522_v53 = vpop.eup %521 }
 0x3e2   :  { %v373_v54 = vmul.f32 %v522_v53, %v520_v51 }
 0x3e4   :  { %374 = vst [vmem:[%s689_s7] sm:$0xff] %v373_v54 }

</bundles_post_ra>
